<compile_context>
chip_gen: v7x
topology: tpu7x:2x2x1
jax: 0.10.0
libtpu: 0.0.40
codegen_flags: <defaults>
</compile_context>

<pallas_src>
import functools

import jax
import jax.numpy as jnp
from jax import lax
from jax.experimental import pallas as pl
from jax.experimental.pallas import tpu as pltpu


def _round_up(v, m):
    return (v + m - 1) // m * m


def _cdiv(a, b):
    return -(-a // b)


def _default_vmem_limit_bytes():
    """~3/4 of physical VMEM capped at 100 MiB: ~48 MiB on v7x (64 MiB VMEM),
    ~96 MiB on v5e/v6e (128 MiB VMEM)."""
    cap = 128 * 1024 * 1024
    try:
        info = pltpu.get_tpu_info()
        cap = int(getattr(info, "vmem_capacity_bytes", cap))
    except Exception:  # conservative fallback (e.g. interpret mode / CPU AOT)
        pass
    return min(100 * 1024 * 1024, (cap * 3) // 4)


def _choose_tile_m(n_rows, tm_max):
    """Row tile (multiple of 8): aim for a row-grid length >= 2 and even so v7x's two
    TensorCores both get work, while bounding pad waste and capping the tile at tm_max."""
    n8 = _round_up(max(n_rows, 1), 8)
    g = max(2, _cdiv(n8, max(tm_max, 8)))
    g = g + (g % 2)                                 # even grid length
    quantum = 32 if n8 >= 64 else 8                 # multiple-of-32 tiles chunk nicely
    tile = _round_up(_cdiv(n8, g), quantum)
    return max(8, min(tile, n8))


def _choose_chunk_rows(tile_m, hp):
    """Row-chunk for the in-kernel top-k loop: keep `cur` (chunk_rows x Hp f32) at ~16 vregs
    so the unrolled k-step chain is register-resident; must divide tile_m, multiple of 8."""
    budget = max(8, (16384 // max(hp, 1)) // 8 * 8)
    c = max(8, min(64, budget, tile_m) // 8 * 8)
    while tile_m % c != 0:
        c -= 8
    return max(c, 8)


def _const_block_spec(shape):
    """Grid-invariant operand: constant block index => copied into VMEM once. Single-buffered
    (pl.Buffered(1)) so the resident footprint is 1x, not 2x (matters for the bf16 weight on
    v7x's 64 MiB VMEM); falls back to the default double-buffered spec on older jax."""
    index_map = lambda i: (0, 0)
    try:
        return pl.BlockSpec(shape, index_map, pipeline_mode=pl.Buffered(1))
    except (TypeError, AttributeError):
        return pl.BlockSpec(shape, index_map)


def sparse_kw_linear_kernel(x_ref, wt_ref, b_ref, boost_ref, o_ref, *, k, chunk_rows):
    # --- Linear: bf16 operands on the MXU, f32 accumulation. ---
    z = jnp.dot(x_ref[...].astype(jnp.bfloat16), wt_ref[...],
                preferred_element_type=jnp.float32)
    z = z + b_ref[...]
    # Park z in the output ref so it is NOT live across the top-k selection (vreg pressure).
    o_ref[...] = z.astype(o_ref.dtype)

    boost = boost_ref[...]                               # (1, Hp) f32, hoisted out of the loop
    neg_inf = jnp.float32(-jnp.inf)
    tile_m = o_ref.shape[0]
    n_chunks = tile_m // chunk_rows

    # --- Top-k winner selection per row, chunked over sublane row groups so the working set
    # (cur + the chunk of z) stays inside the 64-vreg file; fori_loop bounds live ranges. ---
    def chunk_body(c, carry):
        r0 = pl.multiple_of(c * chunk_rows, chunk_rows)
        rows = pl.ds(r0, chunk_rows)
        z_c = o_ref[rows, :].astype(jnp.float32)
        cur = z_c * boost                                # boosted activations (selection only)
        # One XLU row-reduce per winner; static k -> fully unrolled (LLO-visible).
        # Bit-identical boosted ties may co-select (>k kept), same class as torch.topk ties.
        for _ in range(k):
            row_max = jnp.max(cur, axis=-1, keepdims=True)
            cur = jnp.where(cur == row_max, neg_inf, cur)
        keep = cur == neg_inf                            # every extracted slot was overwritten
        # Kept values are the un-boosted linear outputs (matches nupic.torch KWinners).
        o_ref[rows, :] = jnp.where(keep, z_c, 0.0).astype(o_ref.dtype)
        return carry

    lax.fori_loop(0, n_chunks, chunk_body, 0)


def prepare_sparse_kw_params(w_masked, b, boost):
    """One-time (per weight update) packing, hoisted out of the per-call path:
    transpose the (H, D) torch-Linear weight to (D, H), cast to bf16 for the MXU,
    and pad the H axis to a lane-dense multiple of 128. Padded units get a huge
    negative bias (and neutral boost) so they can never be selected as winners."""
    H, D = w_masked.shape
    Hp = _round_up(H, 128)
    wt = jnp.asarray(w_masked, jnp.float32).T.astype(jnp.bfloat16)     # (D, H) bf16
    b_p = jnp.asarray(b, jnp.float32)
    boost_p = jnp.asarray(boost, jnp.float32)
    if Hp != H:
        wt = jnp.pad(wt, ((0, 0), (0, Hp - H)))
        b_p = jnp.pad(b_p, (0, Hp - H), constant_values=-1e30)
        boost_p = jnp.pad(boost_p, (0, Hp - H), constant_values=1.0)
    return wt, b_p.reshape(1, Hp), boost_p.reshape(1, Hp)


def sparse_kw_linear(x, wt, b2, boost2, *, k, out_features, tm=256,
                     out_dtype=jnp.float32, vmem_limit_bytes=None):
    """x: (..., D); wt: (D, Hp) bf16 (pre-transposed, H-padded); b2/boost2: (1, Hp) f32.
    Returns (..., out_features) in out_dtype (use bf16 on v5e to halve the store traffic
    if downstream tolerates it)."""
    orig_shape = x.shape
    D = orig_shape[-1]
    Hp = wt.shape[1]
    assert wt.shape[0] == D
    # If k > out_features the -1e30-padded columns could start "winning"; forbid it.
    assert 0 <= k <= out_features, "k (winners per row) must satisfy 0 <= k <= out_features"

    # bf16 x in the wrapper: the cast fuses with the row-padding copy (pad is a copy anyway),
    # halving x's HBM read per grid step and its double-buffered VMEM footprint.
    x2 = x.reshape(-1, D).astype(jnp.bfloat16)
    N = x2.shape[0]

    tile_m = _choose_tile_m(N, tm)
    n_pad = _round_up(max(N, 1), tile_m)
    if n_pad != N:
        x2 = jnp.pad(x2, ((0, n_pad - N), (0, 0)))
    grid_m = n_pad // tile_m
    chunk_rows = _choose_chunk_rows(tile_m, Hp)

    if vmem_limit_bytes is None:
        vmem_limit_bytes = _default_vmem_limit_bytes()

    out_dtype = jnp.dtype(out_dtype)
    cost = pl.CostEstimate(
        flops=2 * n_pad * D * Hp,
        transcendentals=0,
        bytes_accessed=int(x2.size * x2.dtype.itemsize
                           + wt.size * wt.dtype.itemsize
                           + b2.size * b2.dtype.itemsize
                           + boost2.size * boost2.dtype.itemsize
                           + n_pad * Hp * out_dtype.itemsize),
    )

    # NOTE: for production-sized D on v7x (bf16 weight > ~32 MiB even single-buffered), add a
    # K grid axis ("arbitrary") with an f32 accumulator scratch (P3: zero at k==0, run the
    # boost/top-k/store only on the last K step), keeping the full Hp extent per tile.
    out = pl.pallas_call(
        functools.partial(sparse_kw_linear_kernel, k=k, chunk_rows=chunk_rows),
        out_shape=jax.ShapeDtypeStruct((n_pad, Hp), out_dtype),
        grid_spec=pltpu.PrefetchScalarGridSpec(
            num_scalar_prefetch=0,
            grid=(grid_m,),
            in_specs=[
                pl.BlockSpec((tile_m, D), lambda i: (i, 0)),   # x row tile (bf16)
                _const_block_spec((D, Hp)),                    # weight (D, Hp) bf16, DMA'd once
                _const_block_spec((1, Hp)),                    # bias (padded cols = -1e30)
                _const_block_spec((1, Hp)),                    # boost factors
            ],
            out_specs=pl.BlockSpec((tile_m, Hp), lambda i: (i, 0)),   # lane-dense store
        ),
        compiler_params=pltpu.CompilerParams(
            dimension_semantics=("parallel",),
            vmem_limit_bytes=vmem_limit_bytes,
        ),
        cost_estimate=cost,
    )(x2, wt, b2, boost2)

    out = out[:N, :out_features]
    return out.reshape(orig_shape[:-1] + (out_features,))


def make_sparse_weights(key, input_size, hidden, sparsity):
    """Deterministic nn.Linear-style init + nupic SparseWeights mask
    (zero `round(sparsity * input_size)` weights per output unit)."""
    kw, kb, km = jax.random.split(key, 3)
    bound = 1.0 / jnp.sqrt(jnp.float32(input_size))
    w = jax.random.uniform(kw, (hidden, input_size), jnp.float32, -bound, bound)
    b = jax.random.uniform(kb, (hidden,), jnp.float32, -bound, bound)

    num_zeros = int(round(sparsity * input_size))
    scores = jax.random.uniform(km, (hidden, input_size))
    ranks = jnp.argsort(jnp.argsort(scores, axis=-1), axis=-1)
    mask = (ranks >= num_zeros).astype(jnp.float32)   # exactly num_zeros zeros per row
    return w * mask, b


if __name__ == "__main__":
    # Module hyper-params (small, consistent with the forward pass).
    input_size = 128
    hidden = 96            # deliberately not a multiple of 128 -> exercises lane padding
    sparsity = 0.5
    percent_on = 0.25
    boost_strength = 1.5

    batch, seq = 2, 8      # x: (batch, seq, input_size); forward flattens to (batch*seq, hidden)

    key = jax.random.PRNGKey(0)
    k_x, k_params, k_duty = jax.random.split(key, 3)

    x = jax.random.normal(k_x, (batch, seq, input_size), dtype=jnp.float32)
    w_masked, b = make_sparse_weights(k_params, input_size, hidden, sparsity)

    # KWinners: k winners per row; non-trivial duty cycles so boosting is exercised.
    k = int(round(hidden * percent_on))
    duty_cycles = jax.random.uniform(k_duty, (hidden,), jnp.float32, 0.0, 2.0 * percent_on)
    target_density = float(k) / float(hidden)
    boost = jnp.exp((target_density - duty_cycles) * boost_strength)

    wt, b2, boost2 = prepare_sparse_kw_params(w_masked, b, boost)
    fwd = jax.jit(functools.partial(sparse_kw_linear, k=k, out_features=hidden))

    out = jax.block_until_ready(fwd(x, wt, b2, boost2))

    # Reference (same bf16 MXU cast as the kernel) and checks.
    x2 = x.reshape(-1, input_size)
    z_ref = jnp.dot(x2.astype(jnp.bfloat16), w_masked.T.astype(jnp.bfloat16),
                    preferred_element_type=jnp.float32) + b
    boosted_ref = z_ref * boost[None, :]

    o2 = out.reshape(-1, hidden)
    sel = o2 != 0.0
    nz = jnp.sum(sel, axis=-1)
    assert bool(jnp.all(nz == k)), f"expected {k} winners per row, got {nz}"
    # Kept values are the un-boosted linear outputs.
    assert bool(jnp.allclose(jnp.where(sel, o2, 0.0), jnp.where(sel, z_ref, 0.0),
                             atol=1e-3, rtol=1e-3))
    # Selected units are exactly the top-k by boosted activation.
    min_win = jnp.min(jnp.where(sel, boosted_ref, jnp.inf), axis=-1)
    max_lose = jnp.max(jnp.where(sel, -jnp.inf, boosted_ref), axis=-1)
    assert bool(jnp.all(min_win >= max_lose - 1e-4))

    print("KERNEL_OK")
</pallas_src>

<mosaic_0001>
module attributes {stable_mosaic.version = 11 : i64} {
  func.func @sparse_kw_linear_kernel(%arg0: i32, %arg1: memref<8x128xbf16, #tpu.memory_space<vmem>>, %arg2: memref<128x128xbf16, #tpu.memory_space<vmem>>, %arg3: memref<1x128xf32, #tpu.memory_space<vmem>>, %arg4: memref<1x128xf32, #tpu.memory_space<vmem>>, %arg5: memref<8x128xf32, #tpu.memory_space<vmem>>) attributes {dimension_semantics = [#tpu.dimension_semantics<parallel>], iteration_bounds = array<i64: 2>, scalar_prefetch = 0 : i64, scratch_operands = 0 : i64, tpu.core_type = #tpu.core_type<tc>, window_params = [{transform_indices = @transform_0, window_bounds = array<i64: 8, 128>}, {pipeline_mode = #tpu.pipeline_mode<synchronous>, transform_indices = @transform_1, window_bounds = array<i64: 128, 128>}, {pipeline_mode = #tpu.pipeline_mode<synchronous>, transform_indices = @transform_2, window_bounds = array<i64: 1, 128>}, {pipeline_mode = #tpu.pipeline_mode<synchronous>, transform_indices = @transform_3, window_bounds = array<i64: 1, 128>}, {transform_indices = @transform_4, window_bounds = array<i64: 8, 128>}]} {
    %c0 = arith.constant 0 : index
    %c0_0 = arith.constant 0 : index
    %0 = vector.load %arg1[%c0, %c0_0] : memref<8x128xbf16, #tpu.memory_space<vmem>>, vector<8x128xbf16>
    %c0_1 = arith.constant 0 : index
    %c0_2 = arith.constant 0 : index
    %1 = vector.load %arg2[%c0_1, %c0_2] : memref<128x128xbf16, #tpu.memory_space<vmem>>, vector<128x128xbf16>
    %cst = arith.constant dense<0.000000e+00> : vector<8x128xf32>
    %2 = tpu.matmul %0, %1, %cst {dimension_numbers = #tpu.dot_dimension_numbers<[1], [0], [0], [1], [0, 0, 1, 1], [], []>} : vector<8x128xbf16>, vector<128x128xbf16>, vector<8x128xf32> -> vector<8x128xf32>
    %c0_3 = arith.constant 0 : index
    %c0_4 = arith.constant 0 : index
    %3 = vector.load %arg3[%c0_3, %c0_4] : memref<1x128xf32, #tpu.memory_space<vmem>>, vector<1x128xf32>
    %4 = vector.broadcast %3 : vector<1x128xf32> to vector<8x128xf32>
    %5 = arith.addf %2, %4 : vector<8x128xf32>
    %c0_5 = arith.constant 0 : index
    %c0_6 = arith.constant 0 : index
    %6 = vector.load %arg5[%c0_5, %c0_6] : memref<8x128xf32, #tpu.memory_space<vmem>>, vector<8x128xf32>
    tpu.vector_store %arg5[%c0_5, %c0_6], %5 {strides = array<i32>} : memref<8x128xf32, #tpu.memory_space<vmem>>, vector<8x128xf32>,
    %c0_7 = arith.constant 0 : index
    %c0_8 = arith.constant 0 : index
    %7 = vector.load %arg4[%c0_7, %c0_8] : memref<1x128xf32, #tpu.memory_space<vmem>>, vector<1x128xf32>
    %cst_9 = arith.constant 0xFF800000 : f32
    %c0_i32 = arith.constant 0 : i32
    %c8_i32 = arith.constant 8 : i32
    %8 = arith.muli %c0_i32, %c8_i32 : i32
    %9 = tpu.assume_multiple %8, 8 : i32
    %10 = arith.index_cast %9 : i32 to index
    %c0_10 = arith.constant 0 : index
    %11 = vector.load %arg5[%10, %c0_10] : memref<8x128xf32, #tpu.memory_space<vmem>>, vector<8x128xf32>
    %12 = vector.broadcast %7 : vector<1x128xf32> to vector<8x128xf32>
    %13 = arith.mulf %11, %12 : vector<8x128xf32>
    %cst_11 = arith.constant dense<0xFF800000> : vector<8xf32>
    %14 = vector.multi_reduction <maximumf>, %13, %cst_11 [1] : vector<8x128xf32> to vector<8xf32>
    %15 = vector.shape_cast %14 : vector<8xf32> to vector<8x1xf32>
    %16 = vector.broadcast %15 : vector<8x1xf32> to vector<8x128xf32>
    %17 = arith.cmpf oeq, %13, %16 : vector<8x128xf32>
    %18 = vector.broadcast %cst_9 : f32 to vector<8x128xf32>
    %19 = arith.select %17, %18, %13 : vector<8x128xi1>, vector<8x128xf32>
    %cst_12 = arith.constant dense<0xFF800000> : vector<8xf32>
    %20 = vector.multi_reduction <maximumf>, %19, %cst_12 [1] : vector<8x128xf32> to vector<8xf32>
    %21 = vector.shape_cast %20 : vector<8xf32> to vector<8x1xf32>
    %22 = vector.broadcast %21 : vector<8x1xf32> to vector<8x128xf32>
    %23 = arith.cmpf oeq, %19, %22 : vector<8x128xf32>
    %24 = vector.broadcast %cst_9 : f32 to vector<8x128xf32>
    %25 = arith.select %23, %24, %19 : vector<8x128xi1>, vector<8x128xf32>
    %cst_13 = arith.constant dense<0xFF800000> : vector<8xf32>
    %26 = vector.multi_reduction <maximumf>, %25, %cst_13 [1] : vector<8x128xf32> to vector<8xf32>
    %27 = vector.shape_cast %26 : vector<8xf32> to vector<8x1xf32>
    %28 = vector.broadcast %27 : vector<8x1xf32> to vector<8x128xf32>
    %29 = arith.cmpf oeq, %25, %28 : vector<8x128xf32>
    %30 = vector.broadcast %cst_9 : f32 to vector<8x128xf32>
    %31 = arith.select %29, %30, %25 : vector<8x128xi1>, vector<8x128xf32>
    %cst_14 = arith.constant dense<0xFF800000> : vector<8xf32>
    %32 = vector.multi_reduction <maximumf>, %31, %cst_14 [1] : vector<8x128xf32> to vector<8xf32>
    %33 = vector.shape_cast %32 : vector<8xf32> to vector<8x1xf32>
    %34 = vector.broadcast %33 : vector<8x1xf32> to vector<8x128xf32>
    %35 = arith.cmpf oeq, %31, %34 : vector<8x128xf32>
    %36 = vector.broadcast %cst_9 : f32 to vector<8x128xf32>
    %37 = arith.select %35, %36, %31 : vector<8x128xi1>, vector<8x128xf32>
    %cst_15 = arith.constant dense<0xFF800000> : vector<8xf32>
    %38 = vector.multi_reduction <maximumf>, %37, %cst_15 [1] : vector<8x128xf32> to vector<8xf32>
    %39 = vector.shape_cast %38 : vector<8xf32> to vector<8x1xf32>
    %40 = vector.broadcast %39 : vector<8x1xf32> to vector<8x128xf32>
    %41 = arith.cmpf oeq, %37, %40 : vector<8x128xf32>
    %42 = vector.broadcast %cst_9 : f32 to vector<8x128xf32>
    %43 = arith.select %41, %42, %37 : vector<8x128xi1>, vector<8x128xf32>
    %cst_16 = arith.constant dense<0xFF800000> : vector<8xf32>
    %44 = vector.multi_reduction <maximumf>, %43, %cst_16 [1] : vector<8x128xf32> to vector<8xf32>
    %45 = vector.shape_cast %44 : vector<8xf32> to vector<8x1xf32>
    %46 = vector.broadcast %45 : vector<8x1xf32> to vector<8x128xf32>
    %47 = arith.cmpf oeq, %43, %46 : vector<8x128xf32>
    %48 = vector.broadcast %cst_9 : f32 to vector<8x128xf32>
    %49 = arith.select %47, %48, %43 : vector<8x128xi1>, vector<8x128xf32>
    %cst_17 = arith.constant dense<0xFF800000> : vector<8xf32>
    %50 = vector.multi_reduction <maximumf>, %49, %cst_17 [1] : vector<8x128xf32> to vector<8xf32>
    %51 = vector.shape_cast %50 : vector<8xf32> to vector<8x1xf32>
    %52 = vector.broadcast %51 : vector<8x1xf32> to vector<8x128xf32>
    %53 = arith.cmpf oeq, %49, %52 : vector<8x128xf32>
    %54 = vector.broadcast %cst_9 : f32 to vector<8x128xf32>
    %55 = arith.select %53, %54, %49 : vector<8x128xi1>, vector<8x128xf32>
    %cst_18 = arith.constant dense<0xFF800000> : vector<8xf32>
    %56 = vector.multi_reduction <maximumf>, %55, %cst_18 [1] : vector<8x128xf32> to vector<8xf32>
    %57 = vector.shape_cast %56 : vector<8xf32> to vector<8x1xf32>
    %58 = vector.broadcast %57 : vector<8x1xf32> to vector<8x128xf32>
    %59 = arith.cmpf oeq, %55, %58 : vector<8x128xf32>
    %60 = vector.broadcast %cst_9 : f32 to vector<8x128xf32>
    %61 = arith.select %59, %60, %55 : vector<8x128xi1>, vector<8x128xf32>
    %cst_19 = arith.constant dense<0xFF800000> : vector<8xf32>
    %62 = vector.multi_reduction <maximumf>, %61, %cst_19 [1] : vector<8x128xf32> to vector<8xf32>
    %63 = vector.shape_cast %62 : vector<8xf32> to vector<8x1xf32>
    %64 = vector.broadcast %63 : vector<8x1xf32> to vector<8x128xf32>
    %65 = arith.cmpf oeq, %61, %64 : vector<8x128xf32>
    %66 = vector.broadcast %cst_9 : f32 to vector<8x128xf32>
    %67 = arith.select %65, %66, %61 : vector<8x128xi1>, vector<8x128xf32>
    %cst_20 = arith.constant dense<0xFF800000> : vector<8xf32>
    %68 = vector.multi_reduction <maximumf>, %67, %cst_20 [1] : vector<8x128xf32> to vector<8xf32>
    %69 = vector.shape_cast %68 : vector<8xf32> to vector<8x1xf32>
    %70 = vector.broadcast %69 : vector<8x1xf32> to vector<8x128xf32>
    %71 = arith.cmpf oeq, %67, %70 : vector<8x128xf32>
    %72 = vector.broadcast %cst_9 : f32 to vector<8x128xf32>
    %73 = arith.select %71, %72, %67 : vector<8x128xi1>, vector<8x128xf32>
    %cst_21 = arith.constant dense<0xFF800000> : vector<8xf32>
    %74 = vector.multi_reduction <maximumf>, %73, %cst_21 [1] : vector<8x128xf32> to vector<8xf32>
    %75 = vector.shape_cast %74 : vector<8xf32> to vector<8x1xf32>
    %76 = vector.broadcast %75 : vector<8x1xf32> to vector<8x128xf32>
    %77 = arith.cmpf oeq, %73, %76 : vector<8x128xf32>
    %78 = vector.broadcast %cst_9 : f32 to vector<8x128xf32>
    %79 = arith.select %77, %78, %73 : vector<8x128xi1>, vector<8x128xf32>
    %cst_22 = arith.constant dense<0xFF800000> : vector<8xf32>
    %80 = vector.multi_reduction <maximumf>, %79, %cst_22 [1] : vector<8x128xf32> to vector<8xf32>
    %81 = vector.shape_cast %80 : vector<8xf32> to vector<8x1xf32>
    %82 = vector.broadcast %81 : vector<8x1xf32> to vector<8x128xf32>
    %83 = arith.cmpf oeq, %79, %82 : vector<8x128xf32>
    %84 = vector.broadcast %cst_9 : f32 to vector<8x128xf32>
    %85 = arith.select %83, %84, %79 : vector<8x128xi1>, vector<8x128xf32>
    %cst_23 = arith.constant dense<0xFF800000> : vector<8xf32>
    %86 = vector.multi_reduction <maximumf>, %85, %cst_23 [1] : vector<8x128xf32> to vector<8xf32>
    %87 = vector.shape_cast %86 : vector<8xf32> to vector<8x1xf32>
    %88 = vector.broadcast %87 : vector<8x1xf32> to vector<8x128xf32>
    %89 = arith.cmpf oeq, %85, %88 : vector<8x128xf32>
    %90 = vector.broadcast %cst_9 : f32 to vector<8x128xf32>
    %91 = arith.select %89, %90, %85 : vector<8x128xi1>, vector<8x128xf32>
    %cst_24 = arith.constant dense<0xFF800000> : vector<8xf32>
    %92 = vector.multi_reduction <maximumf>, %91, %cst_24 [1] : vector<8x128xf32> to vector<8xf32>
    %93 = vector.shape_cast %92 : vector<8xf32> to vector<8x1xf32>
    %94 = vector.broadcast %93 : vector<8x1xf32> to vector<8x128xf32>
    %95 = arith.cmpf oeq, %91, %94 : vector<8x128xf32>
    %96 = vector.broadcast %cst_9 : f32 to vector<8x128xf32>
    %97 = arith.select %95, %96, %91 : vector<8x128xi1>, vector<8x128xf32>
    %cst_25 = arith.constant dense<0xFF800000> : vector<8xf32>
    %98 = vector.multi_reduction <maximumf>, %97, %cst_25 [1] : vector<8x128xf32> to vector<8xf32>
    %99 = vector.shape_cast %98 : vector<8xf32> to vector<8x1xf32>
    %100 = vector.broadcast %99 : vector<8x1xf32> to vector<8x128xf32>
    %101 = arith.cmpf oeq, %97, %100 : vector<8x128xf32>
    %102 = vector.broadcast %cst_9 : f32 to vector<8x128xf32>
    %103 = arith.select %101, %102, %97 : vector<8x128xi1>, vector<8x128xf32>
    %cst_26 = arith.constant dense<0xFF800000> : vector<8xf32>
    %104 = vector.multi_reduction <maximumf>, %103, %cst_26 [1] : vector<8x128xf32> to vector<8xf32>
    %105 = vector.shape_cast %104 : vector<8xf32> to vector<8x1xf32>
    %106 = vector.broadcast %105 : vector<8x1xf32> to vector<8x128xf32>
    %107 = arith.cmpf oeq, %103, %106 : vector<8x128xf32>
    %108 = vector.broadcast %cst_9 : f32 to vector<8x128xf32>
    %109 = arith.select %107, %108, %103 : vector<8x128xi1>, vector<8x128xf32>
    %cst_27 = arith.constant dense<0xFF800000> : vector<8xf32>
    %110 = vector.multi_reduction <maximumf>, %109, %cst_27 [1] : vector<8x128xf32> to vector<8xf32>
    %111 = vector.shape_cast %110 : vector<8xf32> to vector<8x1xf32>
    %112 = vector.broadcast %111 : vector<8x1xf32> to vector<8x128xf32>
    %113 = arith.cmpf oeq, %109, %112 : vector<8x128xf32>
    %114 = vector.broadcast %cst_9 : f32 to vector<8x128xf32>
    %115 = arith.select %113, %114, %109 : vector<8x128xi1>, vector<8x128xf32>
    %cst_28 = arith.constant dense<0xFF800000> : vector<8xf32>
    %116 = vector.multi_reduction <maximumf>, %115, %cst_28 [1] : vector<8x128xf32> to vector<8xf32>
    %117 = vector.shape_cast %116 : vector<8xf32> to vector<8x1xf32>
    %118 = vector.broadcast %117 : vector<8x1xf32> to vector<8x128xf32>
    %119 = arith.cmpf oeq, %115, %118 : vector<8x128xf32>
    %120 = vector.broadcast %cst_9 : f32 to vector<8x128xf32>
    %121 = arith.select %119, %120, %115 : vector<8x128xi1>, vector<8x128xf32>
    %cst_29 = arith.constant dense<0xFF800000> : vector<8xf32>
    %122 = vector.multi_reduction <maximumf>, %121, %cst_29 [1] : vector<8x128xf32> to vector<8xf32>
    %123 = vector.shape_cast %122 : vector<8xf32> to vector<8x1xf32>
    %124 = vector.broadcast %123 : vector<8x1xf32> to vector<8x128xf32>
    %125 = arith.cmpf oeq, %121, %124 : vector<8x128xf32>
    %126 = vector.broadcast %cst_9 : f32 to vector<8x128xf32>
    %127 = arith.select %125, %126, %121 : vector<8x128xi1>, vector<8x128xf32>
    %cst_30 = arith.constant dense<0xFF800000> : vector<8xf32>
    %128 = vector.multi_reduction <maximumf>, %127, %cst_30 [1] : vector<8x128xf32> to vector<8xf32>
    %129 = vector.shape_cast %128 : vector<8xf32> to vector<8x1xf32>
    %130 = vector.broadcast %129 : vector<8x1xf32> to vector<8x128xf32>
    %131 = arith.cmpf oeq, %127, %130 : vector<8x128xf32>
    %132 = vector.broadcast %cst_9 : f32 to vector<8x128xf32>
    %133 = arith.select %131, %132, %127 : vector<8x128xi1>, vector<8x128xf32>
    %cst_31 = arith.constant dense<0xFF800000> : vector<8xf32>
    %134 = vector.multi_reduction <maximumf>, %133, %cst_31 [1] : vector<8x128xf32> to vector<8xf32>
    %135 = vector.shape_cast %134 : vector<8xf32> to vector<8x1xf32>
    %136 = vector.broadcast %135 : vector<8x1xf32> to vector<8x128xf32>
    %137 = arith.cmpf oeq, %133, %136 : vector<8x128xf32>
    %138 = vector.broadcast %cst_9 : f32 to vector<8x128xf32>
    %139 = arith.select %137, %138, %133 : vector<8x128xi1>, vector<8x128xf32>
    %cst_32 = arith.constant dense<0xFF800000> : vector<8xf32>
    %140 = vector.multi_reduction <maximumf>, %139, %cst_32 [1] : vector<8x128xf32> to vector<8xf32>
    %141 = vector.shape_cast %140 : vector<8xf32> to vector<8x1xf32>
    %142 = vector.broadcast %141 : vector<8x1xf32> to vector<8x128xf32>
    %143 = arith.cmpf oeq, %139, %142 : vector<8x128xf32>
    %144 = vector.broadcast %cst_9 : f32 to vector<8x128xf32>
    %145 = arith.select %143, %144, %139 : vector<8x128xi1>, vector<8x128xf32>
    %cst_33 = arith.constant dense<0xFF800000> : vector<8xf32>
    %146 = vector.multi_reduction <maximumf>, %145, %cst_33 [1] : vector<8x128xf32> to vector<8xf32>
    %147 = vector.shape_cast %146 : vector<8xf32> to vector<8x1xf32>
    %148 = vector.broadcast %147 : vector<8x1xf32> to vector<8x128xf32>
    %149 = arith.cmpf oeq, %145, %148 : vector<8x128xf32>
    %150 = vector.broadcast %cst_9 : f32 to vector<8x128xf32>
    %151 = arith.select %149, %150, %145 : vector<8x128xi1>, vector<8x128xf32>
    %cst_34 = arith.constant dense<0xFF800000> : vector<8xf32>
    %152 = vector.multi_reduction <maximumf>, %151, %cst_34 [1] : vector<8x128xf32> to vector<8xf32>
    %153 = vector.shape_cast %152 : vector<8xf32> to vector<8x1xf32>
    %154 = vector.broadcast %153 : vector<8x1xf32> to vector<8x128xf32>
    %155 = arith.cmpf oeq, %151, %154 : vector<8x128xf32>
    %156 = vector.broadcast %cst_9 : f32 to vector<8x128xf32>
    %157 = arith.select %155, %156, %151 : vector<8x128xi1>, vector<8x128xf32>
    %158 = vector.broadcast %cst_9 : f32 to vector<8x128xf32>
    %159 = arith.cmpf oeq, %157, %158 : vector<8x128xf32>
    %cst_35 = arith.constant 0.000000e+00 : f32
    %160 = vector.broadcast %cst_35 : f32 to vector<8x128xf32>
    %161 = arith.select %159, %11, %160 : vector<8x128xi1>, vector<8x128xf32>
    %162 = arith.index_cast %9 : i32 to index
    %c0_36 = arith.constant 0 : index
    %163 = vector.load %arg5[%162, %c0_36] : memref<8x128xf32, #tpu.memory_space<vmem>>, vector<8x128xf32>
    tpu.vector_store %arg5[%162, %c0_36], %161 {strides = array<i32>} : memref<8x128xf32, #tpu.memory_space<vmem>>, vector<8x128xf32>,
    %c1_i32 = arith.constant 1 : i32
    return
  }
  func.func @transform_0(%arg0: i32) -> (i32, i32) {
    %c0_i32 = arith.constant 0 : i32
    %c0_i32_0 = arith.constant 0 : i32
    return %arg0, %c0_i32 : i32, i32
  }
  func.func @transform_1(%arg0: i32) -> (i32, i32) {
    %c0_i32 = arith.constant 0 : i32
    %c0_i32_0 = arith.constant 0 : i32
    %c0_i32_1 = arith.constant 0 : i32
    return %c0_i32, %c0_i32_0 : i32, i32
  }
  func.func @transform_2(%arg0: i32) -> (i32, i32) {
    %c0_i32 = arith.constant 0 : i32
    %c0_i32_0 = arith.constant 0 : i32
    %c0_i32_1 = arith.constant 0 : i32
    return %c0_i32, %c0_i32_0 : i32, i32
  }
  func.func @transform_3(%arg0: i32) -> (i32, i32) {
    %c0_i32 = arith.constant 0 : i32
    %c0_i32_0 = arith.constant 0 : i32
    %c0_i32_1 = arith.constant 0 : i32
    return %c0_i32, %c0_i32_0 : i32, i32
  }
  func.func @transform_4(%arg0: i32) -> (i32, i32) {
    %c0_i32 = arith.constant 0 : i32
    %c0_i32_0 = arith.constant 0 : i32
    return %arg0, %c0_i32 : i32, i32
  }
}

</mosaic_0001>

<bundles_post_ra>
// kernel: sparse_kw_linear.1
= control target key start
LH: loop header
LB: loop body
LE: loop exit
PB: predicated region body
PF: predicated region fallthrough
CT: control target
= control target key end

     0   :  { %9 = vsyncpa [#allocation3], 0  ;;  %s1221_s0 = inlined_call_operand.hbm [shape: bf16[16,128], index: 0, kind: input, shape index: {}]   ;;  %s1222_s1 = inlined_call_operand.hbm [shape: bf16[128,128], index: 1, kind: input, shape index: {}]   ;;  %s1223_s2 = inlined_call_operand.hbm [shape: f32[1,128], index: 2, kind: input, shape index: {}]   ;;  %s1224_s3 = inlined_call_operand.hbm [shape: f32[1,128], index: 3, kind: input, shape index: {}]   ;;  %s1225_s4 = inlined_call_operand.hbm [shape: f32[16,128], index: 4, kind: output, shape index: {}]  }
   0x1   :  { %11 = vsyncpa [#allocation3 + $0x1], 0 }
   0x2   :  { %12 = vsyncpa [#allocation6], 0 }
   0x3   :  { %13 = vsyncpa [#allocation9], 0 }
   0x4   :  { %14 = vsyncpa [#allocation4], 0 }
   0x5   :  { %16 = vsyncpa [#allocation4 + $0x1], 0  ;;  %s958_s15 = smov 0   ;;  %s960_s16 = smov 0  }
   0x6   :  { %s962_s17 = smov 0   ;;  %s964_s18 = smov 0  }
   0x7 LB: > { %s979_s19 = sadd.s32 4294967295, %s922_s18   ;;  %s588_s20 = sadd.s32 4294967294, %s922_s18   ;;  %s922_s18 = sphi %s964_s18, %s1248_s18   ;;  %s918_s17 = sphi %s962_s17, %s1247_s17   ;;  %s914_s16 = sphi %s960_s16, %s1246_s16   ;;  %s910_s15 = sphi %s958_s15, %s1245_s15  }
   0x8   : > { %p42_p0 = scmp.ne.s32.totalorder %s914_s16, %s910_s15  ;;  %p1226_p1 = scmp.eq.s32.totalorder %s979_s19, 0 }
   0x9   : > { %p135_p3 = scmp.eq.s32.totalorder %s588_s20, 1  ;;  %p589_p5 = scmp.ge.s32.totalorder %s922_s18, 1 }
   0xa   : > { %p988_p4 = por %p1226_p1, %p42_p0  ;;  %p142_p7 = scmp.lt.s32.totalorder %s922_s18, 3 }
   0xb   : > { %p993_p6 = por %p135_p3, %p42_p0  ;;  %s924_s24 = smov [#allocation5]  }
   0xc   : > { %s1229_s21 = scalar_select %p988_p4, 1, 0 }
   0xd   : > { %s1230_s22 = scalar_select %p993_p6, 1, 0 }
   0xe   : > { %p998_p8 = pnand %p589_p5, %p142_p7  ;;  %s154_s25 = sshll.u32 %s924_s24, 4  ;;  %s1002_s25 = int_to_ptr.vmem [resolvable:$true] %s154_s25 }
   0xf   : > { %s925_s27 = smov [#allocation7]   ;;  %s926_s29 = smov [#allocation8]  }
  0x10   : > { %s1231_s23 = scalar_select %p998_p8, 1, 0 }
  0x11   : > { %p661_p9 = pneg %p998_p8  ;;  %s168_s28 = sshll.u32 %s925_s27, 4  ;;  %s1013_s28 = int_to_ptr.vmem [resolvable:$true] %s168_s28 }
  0x12   : > { %s1015_s30 = sshll.u32 %s926_s29, 4  ;;  %s734_s7 = scalar_lea.hbm %s1222_s1, 1024  ;;  %s180_s30 = int_to_ptr.vmem [resolvable:$true] %s1015_s30 }
  0x13   : > { %p1009_p11 = pnand %p661_p9, %p1226_p1  ;;  %p735_p12 = scmp.ne.s32.totalorder %s1222_s1, %s734_s7 }
  0x14   : > { %p741_p5 = scmp.lt.u32.totalorder %s734_s7, %s1222_s1 }
  0x15   : > { %p1025_p13 = pneg %p1009_p11 }
  0x17   : > { %p737_p0 = pnand %p1025_p13, %p735_p12 }
  0x19   : > { %p738_p3 = pneg %p737_p0 }
  0x1b   : > { %p743_p7 = pnand %p741_p5, %p738_p3 }
  0x1d   : > { %746 = shalt.err (!%p743_p7)
}
  0x1e   : > { %s747_s13 = scalar_lea.vmem %s1002_s25, 1024  ;;  %p755_p2 = scmp.lt.s32.totalorder %s1002_s25, %s1002_s25 }
  0x1f   : > { %p748_p9 = scmp.ne.s32.totalorder %s1002_s25, %s747_s13  ;;  %p756_p6 = scmp.lt.s32.totalorder %s747_s13, %s747_s13 }
  0x21   : > { %p750_p10 = pnand %p748_p9, %p1025_p13  ;;  %p757_p12 = por %p756_p6, %p755_p2 }
  0x23   : > { %p751_p1 = pneg %p750_p10 }
  0x25   : > { %p758_p0 = pnand %p757_p12, %p751_p1 }
  0x27   : > { %761 = shalt.err (!%p758_p0)
}
  0x28   : > { %s927_s14 = smov 64   ;;  %s928_s20 = smov 4  }
  0x29   : > { %664 = dma.hbm_to_vmem [thread:$0]  (!%p1009_p11), %s1222_s1, 1024, %s1002_s25, [#allocation6], %s927_s14, %s927_s14, %s928_s20  }
  0x2a   : > { %s762_s6 = scalar_lea.hbm %s1223_s2, 16 }
  0x2b   : > { %p763_p2 = scmp.ne.s32.totalorder %s1223_s2, %s762_s6  ;;  %p769_p10 = scmp.lt.u32.totalorder %s762_s6, %s1223_s2 }
  0x2d   : > { %p765_p1 = pnand %p763_p2, %p1025_p13 }
  0x2f   : > { %p766_p6 = pneg %p765_p1 }
  0x31   : > { %p771_p3 = pnand %p769_p10, %p766_p6 }
  0x33   : > { %774 = shalt.err (!%p771_p3)
}
  0x34   : > { %s775_s25 = scalar_lea.vmem %s1013_s28, 16  ;;  %s782_s12 = scalar_lea.vmem %s1013_s28, 32 }
  0x35   : > { %p776_p5 = scmp.ne.s32.totalorder %s1013_s28, %s775_s25  ;;  %p783_p12 = scmp.lt.s32.totalorder %s1013_s28, %s1013_s28 }
  0x36   : > { %p784_p0 = scmp.lt.s32.totalorder %s782_s12, %s775_s25 }
  0x37   : > { %p778_p7 = pnand %p776_p5, %p1025_p13 }
  0x38   : > { %p785_p2 = por %p784_p0, %p783_p12 }
  0x39   : > { %p779_p9 = pneg %p778_p7 }
  0x3b   : > { %p786_p1 = pnand %p785_p2, %p779_p9 }
  0x3d   : > { %789 = shalt.err (!%p786_p1)
}
  0x3e   : > { %667 = dma.hbm_to_vmem [thread:$0]  (!%p1009_p11), %s1223_s2, 16, %s1013_s28, [#allocation6]  }
  0x3f   : > { %s790_s27 = scalar_lea.hbm %s1224_s3, 16 }
  0x40   : > { %p791_p6 = scmp.ne.s32.totalorder %s1224_s3, %s790_s27  ;;  %p797_p5 = scmp.lt.u32.totalorder %s790_s27, %s1224_s3 }
  0x42   : > { %p793_p10 = pnand %p791_p6, %p1025_p13 }
  0x44   : > { %p794_p3 = pneg %p793_p10 }
  0x46   : > { %p799_p7 = pnand %p797_p5, %p794_p3 }
  0x48   : > { %802 = shalt.err (!%p799_p7)
}
  0x49   : > { %s803_s8 = scalar_lea.vmem %s180_s30, 16  ;;  %s810_s28 = scalar_lea.vmem %s180_s30, 32 }
  0x4a   : > { %p804_p9 = scmp.ne.s32.totalorder %s180_s30, %s803_s8  ;;  %p811_p2 = scmp.lt.s32.totalorder %s180_s30, %s180_s30 }
  0x4b   : > { %p812_p1 = scmp.lt.s32.totalorder %s810_s28, %s803_s8 }
  0x4c   : > { %p806_p12 = pnand %p804_p9, %p1025_p13 }
  0x4d   : > { %p813_p4 = por %p812_p1, %p811_p2 }
  0x4e   : > { %p807_p0 = pneg %p806_p12 }
  0x50   : > { %p814_p8 = pnand %p813_p4, %p807_p0 }
  0x52   : > { %817 = shalt.err (!%p814_p8)
}
  0x53   : > { %670 = dma.hbm_to_vmem [thread:$0]  (!%p1009_p11), %s1224_s3, 16, %s180_s30, [#allocation9]  }
  0x54   : > { %s1090_s10 = sadd.s32 1, %s922_s18   ;;  %s29_s26 = sadd.s32 1, %s918_s17 }
  0x55   : > { %s26_s25 = ssub.s32 %s922_s18, %s1090_s10  ;;  %p36_p8 = scmp.ne.s32.totalorder %s918_s17, %s914_s16 }
  0x56   : > { %p27_p4 = scmp.eq.s32.totalorder %s26_s25, 0  ;;  %p37_p13 = scmp.eq.s32.totalorder %s922_s18, 0 }
  0x57   : > { %p682_p6 = scmp.lt.s32.totalorder %s922_s18, 2  ;;  %p1234_p3 = scmp.eq.s32.totalorder %s979_s19, 1 }
  0x58   : > { %s1100_s12 = scalar_select %p27_p4, %s918_s17, %s29_s26  }
  0x59   : > { %p38_p10 = por %p37_p13, %p36_p8  ;;  %p1104_p5 = por %p1234_p3, %p36_p8 }
  0x5a   : > { %s190_s14 = sand.u32 1, %s918_s17   ;;  %s595_s20 = sshll.u32 %s922_s18, 6 }
  0x5b   : > { %s594_s30 = sshll.u32 %s190_s14, 2  ;;  %s1113_s29 = scalar_lea.hbm %s1221_s0, %s595_s20 }
  0x5c   : > { %s194_s5 = scalar_lea.vmem [#allocation2], %s594_s30  ;;  %p1115_p11 = pnand %p682_p6, %p38_p10 }
  0x5d   : > { %s201_s6 = sshll.u32 %s194_s5, 4  ;;  %s191_s8 = scalar_lea.sflag [#allocation3], %s190_s14  ;;  %s1119_s6 = int_to_ptr.vmem [resolvable:$true] %s201_s6 }
  0x5e   : > { %s818_s28 = scalar_lea.hbm %s1113_s29, 64  ;;  %p820_p9 = pneg %p1115_p11 }
  0x5f   : > { %p819_p7 = scmp.ne.s32.totalorder %s1113_s29, %s818_s28  ;;  %s823_s25 = scalar_lea.hbm %s1221_s0, 128 }
  0x60   : > { %p824_p2 = scmp.lt.u32.totalorder %s1113_s29, %s1221_s0  ;;  %p825_p1 = scmp.lt.u32.totalorder %s823_s25, %s818_s28 }
  0x61   : > { %p821_p12 = pnand %p820_p9, %p819_p7  ;;  %p827_p8 = scmp.lt.u32.totalorder %s818_s28, %s1113_s29 }
  0x62   : > { %p826_p4 = por %p825_p1, %p824_p2 }
  0x63   : > { %p822_p0 = pneg %p821_p12 }
  0x64   : > { %p828_p13 = por %p827_p8, %p826_p4 }
  0x66   : > { %p829_p6 = pnand %p828_p13, %p822_p0 }
  0x68   : > { %832 = shalt.err (!%p829_p6)
}
  0x69   : > { %s833_s14 = scalar_lea.vmem %s1119_s6, 64  ;;  %s929_s30 = smov [#allocation2]  }
  0x6a   : > { %p834_p10 = scmp.ne.s32.totalorder %s1119_s6, %s833_s14  ;;  %s838_s24 = sshll.u32 %s929_s30, 4  ;;  %s839_s24 = int_to_ptr.vmem [resolvable:$false] %s838_s24 }
  0x6b   : > { %s840_s27 = scalar_lea.vmem %s839_s24, 128  ;;  %p841_p12 = scmp.lt.s32.totalorder %s1119_s6, %s839_s24 }
  0x6c   : > { %p836_p3 = pnand %p834_p10, %p820_p9  ;;  %p842_p2 = scmp.lt.s32.totalorder %s840_s27, %s833_s14 }
  0x6e   : > { %p837_p7 = pneg %p836_p3  ;;  %p843_p1 = por %p842_p2, %p841_p12 }
  0x70   : > { %p844_p4 = pnand %p843_p1, %p837_p7 }
  0x72   : > { %847 = shalt.err (!%p844_p4)
}
  0x73   : > { %674 = dma.hbm_to_vmem [thread:$0]  (!%p1115_p11), %s1113_s29, 64, %s1119_s6, %s191_s8  }
  0x74   : > { %p1237_p0 = scmp.ne.s32.totalorder %s1231_s23, 0 }
  0x75   : > { %s1149_s5 = sand.u32 (!%p1237_p0), 1, %s914_s16   ;;  %p1238_p9 = scmp.ne.s32.totalorder (!%p1237_p0), %s1229_s21, 0 }
  0x76   : > { %210 = sbr.rel (%p1237_p0) target bundleno = 3854 (0xf0e), region = 36  ;;  %s597_s28 = sshll.u32 (!%p1237_p0), %s1149_s5, 2 }
  0x77   : > { %s213_s9 = scalar_lea.sflag (!%p1237_p0), [#allocation3], %s1149_s5  ;;  %s1153_s11 = scalar_lea.vmem (!%p1237_p0), [#allocation2], %s597_s28 }
  0x7d   : > { %893 = dma.done.wait (%p1238_p9), %s213_s9, 64  }
  0x7e   : > { %895 = vsyncadd (%p1238_p9), %s213_s9, 4294967232  ;;  %p1239_p11 = scmp.eq.s32.totalorder %s979_s19, 0 }
  0x80   : > { %897 = dma.done.wait (%p1239_p11), [#allocation6], 1040   ;;  %p1240_p8 = pmov %p1239_p11 }
  0x82   : > { %899 = vsyncadd (%p1240_p8), [#allocation6], 4294966256  ;;  %p1241_p13 = pmov %p1240_p8 }
  0x83   : > { %p1242_p6 = pmov %p1240_p8 }
  0x84   : > { %901 = dma.done.wait (%p1241_p13), [#allocation9], 16  }
  0x85   : > { %903 = vsyncadd (%p1242_p6), [#allocation9], 4294967280  ;;  %v930_v0 = vmov 0.0   ;;  %vm931_vm0 = vmmov 0   ;;  %v726_v1 = vld [vmem:[#allocation5] sm:$0xff]   ;;  %v727_v2 = vld [vmem:[#allocation5 + $0x8] sm:$0xff]  }
  0x86   : > { %625 = vmatprep.subr.bf16.mxu0 %v930_v0  ;;  %641 = vmatprep.mubr.msk.bf16.mxu0 %vm931_vm0, %v930_v0  ;;  %v728_v3 = vld [vmem:[#allocation5 + $0x10] sm:$0xff]   ;;  %v729_v4 = vld [vmem:[#allocation5 + $0x18] sm:$0xff]   ;;  %v730_v5 = vld [vmem:[#allocation5 + $0x20] sm:$0xff]   ;;  %s601_s21 = sshll.u32 %s1149_s5, 3  ;;  %s613_s23 = sshll.u32 %s979_s19, 7 }
  0x87   : > { %626 = vmatpush3.bf16.msra.mxu0 %v726_v1  ;;  %v731_v6 = vld [vmem:[#allocation5 + $0x28] sm:$0xff]   ;;  %v732_v7 = vld [vmem:[#allocation5 + $0x30] sm:$0xff]   ;;  %v733_v8 = vld [vmem:[#allocation5 + $0x38] sm:$0xff]   ;;  %s252_s29 = scalar_lea.vmem [#allocation10], %s601_s21  ;;  %s1176_s25 = scalar_lea.hbm %s1225_s4, %s613_s23 }
  0x88   : > { %627 = vmatprep.subr.bf16.mxu0 %v930_v0  ;;  %v254_v9 = vld [vmem:[%s1153_s11] sm:$0xf]  ;;  %v602_v10 = vld [vmem:[#allocation7] ss:$0 sm:$0xff]  ;;  %v611_v12 = vld [vmem:[#allocation8] ss:$0 sm:$0xff] }
  0x89   : > { %s489_s6 = sshll.u32 %s252_s29, 4  ;;  %s476_s26 = scalar_lea.sflag [#allocation4], %s1149_s5  ;;  %s1178_s6 = int_to_ptr.vmem [resolvable:$true] %s489_s6 }
  0x8a   : > { %s848_s19 = scalar_lea.vmem %s1178_s6, 128  ;;  %s932_s20 = smov [#allocation10]  }
  0x8b   : > { %628 = vmatpush3.bf16.msra.mxu0 %v727_v2  ;;  %p849_p10 = scmp.ne.s32.totalorder %s1178_s6, %s848_s19  ;;  %s852_s14 = sshll.u32 %s932_s20, 4  ;;  %s853_s14 = int_to_ptr.vmem [resolvable:$false] %s852_s14 }
  0x8c   : > { %629 = vmatprep.subr.bf16.mxu0 %v930_v0  ;;  %s854_s30 = scalar_lea.vmem %s853_s14, 256  ;;  %p855_p12 = scmp.lt.s32.totalorder %s1178_s6, %s853_s14 }
  0x8d   : > { %p850_p3 = pnand %p849_p10, %p1104_p5  ;;  %p856_p2 = scmp.lt.s32.totalorder %s854_s30, %s848_s19 }
  0x8f   : > { %630 = vmatpush3.bf16.msra.mxu0 %v728_v3  ;;  %p851_p7 = pneg %p850_p3  ;;  %p857_p1 = por %p856_p2, %p855_p12 }
  0x90   : > { %631 = vmatprep.subr.bf16.mxu0 %v930_v0 }
  0x91   : > { %p858_p4 = pnand %p857_p1, %p851_p7 }
  0x93   : > { %632 = vmatpush3.bf16.msra.mxu0 %v729_v4 }
  0x94   : > { %633 = vmatprep.subr.bf16.mxu0 %v930_v0 }
  0x97   : > { %634 = vmatpush3.bf16.msra.mxu0 %v730_v5 }
  0x98   : > { %635 = vmatprep.subr.bf16.mxu0 %v930_v0 }
  0x9b   : > { %636 = vmatpush3.bf16.msra.mxu0 %v731_v6 }
  0x9c   : > { %637 = vmatprep.subr.bf16.mxu0 %v930_v0 }
  0x9f   : > { %638 = vmatpush3.bf16.msra.mxu0 %v732_v7 }
  0xa0   : > { %639 = vmatprep.subr.bf16.mxu0 %v930_v0 }
  0xa3   : > { %640 = vmatpush3.bf16.msra.mxu0 %v733_v8 }
  0xa6   : > { %642 = vmatmul.mubr.bf16.vlgmr.msra.gmra.mrb[0].mxu0 %v254_v9 }
 0x179   : > { %v360_v11 = vpop.f32.mrb[0].mxu0 }
 0x17a   : > { %v1168_v13 = vadd.f32 %v602_v10, %v360_v11  ;;  %v643_v14 = vpop.f32.mrb[1].mxu0 }
 0x17b   : > { %v363_v15 = vpop.f32.mrb[2].mxu0 }
 0x17c   : > { %v644_v16 = vpop.f32.mrb[3].mxu0  ;;  %v375_v17 = vmul.f32 %v611_v12, %v1168_v13 }
 0x17e   : > { %376 = vmax.xlane.f32.xlu0 %v375_v17 }
 0x20b   : > { %v377_v18 = vpop.xlane.xlu0 %376 }
 0x20c   : > { %vm378_vm1 = vcmp.eq.f32.partialorder %v375_v17, %v377_v18 }
 0x20d   : > { %v379_v19 = vsel %vm378_vm1, -inf, %v375_v17 }
 0x20e   : > { %380 = vmax.xlane.f32.xlu0 %v379_v19 }
 0x29b   : > { %v381_v20 = vpop.xlane.xlu0 %380 }
 0x29c   : > { %vm382_vm2 = vcmp.eq.f32.partialorder %v379_v19, %v381_v20 }
 0x29d   : > { %v383_v21 = vsel %vm382_vm2, -inf, %v379_v19 }
 0x29e   : > { %384 = vmax.xlane.f32.xlu1 %v383_v21 }
 0x32b   : > { %v385_v22 = vpop.xlane.xlu1 %384 }
 0x32c   : > { %vm386_vm3 = vcmp.eq.f32.partialorder %v383_v21, %v385_v22 }
 0x32d   : > { %v387_v23 = vsel %vm386_vm3, -inf, %v383_v21 }
 0x32e   : > { %388 = vmax.xlane.f32.xlu1 %v387_v23 }
 0x3bb   : > { %v389_v24 = vpop.xlane.xlu1 %388 }
 0x3bc   : > { %vm390_vm4 = vcmp.eq.f32.partialorder %v387_v23, %v389_v24 }
 0x3bd   : > { %v391_v25 = vsel %vm390_vm4, -inf, %v387_v23 }
 0x3be   : > { %392 = vmax.xlane.f32.xlu0 %v391_v25 }
 0x44b   : > { %v393_v26 = vpop.xlane.xlu0 %392 }
 0x44c   : > { %vm394_vm5 = vcmp.eq.f32.partialorder %v391_v25, %v393_v26 }
 0x44d   : > { %v395_v27 = vsel %vm394_vm5, -inf, %v391_v25 }
 0x44e   : > { %396 = vmax.xlane.f32.xlu1 %v395_v27 }
 0x4db   : > { %v397_v28 = vpop.xlane.xlu1 %396 }
 0x4dc   : > { %vm398_vm6 = vcmp.eq.f32.partialorder %v395_v27, %v397_v28 }
 0x4dd   : > { %v399_v29 = vsel %vm398_vm6, -inf, %v395_v27 }
 0x4de   : > { %400 = vmax.xlane.f32.xlu0 %v399_v29 }
 0x56b   : > { %v401_v30 = vpop.xlane.xlu0 %400 }
 0x56c   : > { %vm402_vm7 = vcmp.eq.f32.partialorder %v399_v29, %v401_v30 }
 0x56d   : > { %v403_v31 = vsel %vm402_vm7, -inf, %v399_v29 }
 0x56e   : > { %404 = vmax.xlane.f32.xlu1 %v403_v31 }
 0x5fb   : > { %v405_v32 = vpop.xlane.xlu1 %404 }
 0x5fc   : > { %vm406_vm8 = vcmp.eq.f32.partialorder %v403_v31, %v405_v32 }
 0x5fd   : > { %v407_v33 = vsel %vm406_vm8, -inf, %v403_v31 }
 0x5fe   : > { %408 = vmax.xlane.f32.xlu0 %v407_v33 }
 0x68b   : > { %v409_v34 = vpop.xlane.xlu0 %408 }
 0x68c   : > { %vm410_vm9 = vcmp.eq.f32.partialorder %v407_v33, %v409_v34 }
 0x68d   : > { %v411_v35 = vsel %vm410_vm9, -inf, %v407_v33 }
 0x68e   : > { %412 = vmax.xlane.f32.xlu1 %v411_v35 }
 0x71b   : > { %v413_v36 = vpop.xlane.xlu1 %412 }
 0x71c   : > { %vm414_vm10 = vcmp.eq.f32.partialorder %v411_v35, %v413_v36 }
 0x71d   : > { %v415_v37 = vsel %vm414_vm10, -inf, %v411_v35 }
 0x71e   : > { %416 = vmax.xlane.f32.xlu0 %v415_v37 }
 0x7ab   : > { %v417_v38 = vpop.xlane.xlu0 %416 }
 0x7ac   : > { %vm418_vm11 = vcmp.eq.f32.partialorder %v415_v37, %v417_v38 }
 0x7ad   : > { %v419_v39 = vsel %vm418_vm11, -inf, %v415_v37 }
 0x7ae   : > { %420 = vmax.xlane.f32.xlu1 %v419_v39 }
 0x83b   : > { %v421_v40 = vpop.xlane.xlu1 %420 }
 0x83c   : > { %vm422_vm12 = vcmp.eq.f32.partialorder %v419_v39, %v421_v40 }
 0x83d   : > { %v423_v41 = vsel %vm422_vm12, -inf, %v419_v39 }
 0x83e   : > { %424 = vmax.xlane.f32.xlu0 %v423_v41 }
 0x8cb   : > { %v425_v42 = vpop.xlane.xlu0 %424 }
 0x8cc   : > { %vm426_vm13 = vcmp.eq.f32.partialorder %v423_v41, %v425_v42 }
 0x8cd   : > { %v427_v43 = vsel %vm426_vm13, -inf, %v423_v41 }
 0x8ce   : > { %428 = vmax.xlane.f32.xlu1 %v427_v43 }
 0x95b   : > { %v429_v44 = vpop.xlane.xlu1 %428 }
 0x95c   : > { %vm430_vm14 = vcmp.eq.f32.partialorder %v427_v43, %v429_v44 }
 0x95d   : > { %v431_v45 = vsel %vm430_vm14, -inf, %v427_v43 }
 0x95e   : > { %432 = vmax.xlane.f32.xlu0 %v431_v45 }
 0x9eb   : > { %v433_v46 = vpop.xlane.xlu0 %432 }
 0x9ec   : > { %vm434_vm15 = vcmp.eq.f32.partialorder %v431_v45, %v433_v46 }
 0x9ed   : > { %v435_v47 = vsel %vm434_vm15, -inf, %v431_v45 }
 0x9ee   : > { %436 = vmax.xlane.f32.xlu1 %v435_v47 }
 0xa7b   : > { %v437_v48 = vpop.xlane.xlu1 %436 }
 0xa7c   : > { %vm438_vm0 = vcmp.eq.f32.partialorder %v435_v47, %v437_v48 }
 0xa7d   : > { %v439_v49 = vsel %vm438_vm0, -inf, %v435_v47 }
 0xa7e   : > { %440 = vmax.xlane.f32.xlu0 %v439_v49 }
 0xb0b   : > { %v441_v50 = vpop.xlane.xlu0 %440 }
 0xb0c   : > { %vm442_vm1 = vcmp.eq.f32.partialorder %v439_v49, %v441_v50 }
 0xb0d   : > { %v443_v51 = vsel %vm442_vm1, -inf, %v439_v49 }
 0xb0e   : > { %444 = vmax.xlane.f32.xlu1 %v443_v51 }
 0xb9b   : > { %v445_v52 = vpop.xlane.xlu1 %444 }
 0xb9c   : > { %vm446_vm2 = vcmp.eq.f32.partialorder %v443_v51, %v445_v52 }
 0xb9d   : > { %v447_v53 = vsel %vm446_vm2, -inf, %v443_v51 }
 0xb9e   : > { %448 = vmax.xlane.f32.xlu0 %v447_v53 }
 0xc2b   : > { %v449_v54 = vpop.xlane.xlu0 %448 }
 0xc2c   : > { %vm450_vm3 = vcmp.eq.f32.partialorder %v447_v53, %v449_v54 }
 0xc2d   : > { %v451_v55 = vsel %vm450_vm3, -inf, %v447_v53 }
 0xc2e   : > { %452 = vmax.xlane.f32.xlu1 %v451_v55 }
 0xcbb   : > { %v453_v56 = vpop.xlane.xlu1 %452 }
 0xcbc   : > { %vm454_vm4 = vcmp.eq.f32.partialorder %v451_v55, %v453_v56 }
 0xcbd   : > { %v455_v57 = vsel %vm454_vm4, -inf, %v451_v55 }
 0xcbe   : > { %456 = vmax.xlane.f32.xlu0 %v455_v57 }
 0xd4b   : > { %v457_v58 = vpop.xlane.xlu0 %456 }
 0xd4c   : > { %vm458_vm5 = vcmp.eq.f32.partialorder %v455_v57, %v457_v58 }
 0xd4d   : > { %v459_v59 = vsel %vm458_vm5, -inf, %v455_v57 }
 0xd4e   : > { %460 = vmax.xlane.f32.xlu1 %v459_v59 }
 0xddb   : > { %v461_v60 = vpop.xlane.xlu1 %460 }
 0xddc   : > { %vm462_vm6 = vcmp.eq.f32.partialorder %v459_v59, %v461_v60 }
 0xddd   : > { %v463_v61 = vsel %vm462_vm6, -inf, %v459_v59 }
 0xdde   : > { %464 = vmax.xlane.f32.xlu0 %v463_v61 }
 0xe6b   : > { %v465_v62 = vpop.xlane.xlu0 %464 }
 0xe6c   : > { %vm466_vm7 = vcmp.eq.f32.partialorder %v463_v61, %v465_v62 }
 0xe6d   : > { %v467_v63 = vsel %vm466_vm7, -inf, %v463_v61 }
 0xe6e   : > { %468 = vmax.xlane.f32.xlu1 %v467_v63 }
 0xefb   : > { %v469_v0 = vpop.xlane.xlu1 %468 }
 0xefc   : > { %vm470_vm8 = vcmp.eq.f32.partialorder %v467_v63, %v469_v0 }
 0xefd   : > { %v471_v1 = vsel %vm470_vm8, -inf, %v467_v63 }
 0xefe   : > { %vm472_vm9 = vcmp.eq.f32.partialorder %v471_v1, -inf }
 0xeff   : > { %v473_v2 = vsel %vm472_vm9, %v1168_v13, 0.0 }
 0xf00   : > { %474 = vst [vmem:[%s252_s29] sm:$0xff] %v473_v2 }
 0xf01   : > { %861 = shalt.err (!%p858_p4)
}
 0xf02   : > { %s862_s24 = scalar_lea.hbm %s1176_s25, 128  ;;  %s866_s28 = scalar_lea.hbm %s1225_s4, 256 }
 0xf03   : > { %p863_p0 = scmp.ne.s32.totalorder %s1176_s25, %s862_s24  ;;  %p867_p8 = scmp.lt.u32.totalorder %s1176_s25, %s1225_s4 }
 0xf04   : > { %p868_p13 = scmp.lt.u32.totalorder %s866_s28, %s862_s24  ;;  %p870_p10 = scmp.lt.u32.totalorder %s862_s24, %s1176_s25 }
 0xf05   : > { %p864_p9 = pnand %p863_p0, %p1104_p5 }
 0xf06   : > { %p869_p6 = por %p868_p13, %p867_p8 }
 0xf07   : > { %p865_p11 = pneg %p864_p9 }
 0xf08   : > { %p871_p3 = por %p870_p10, %p869_p6 }
 0xf0a   : > { %p872_p7 = pnand %p871_p3, %p865_p11 }
 0xf0c   : > { %875 = shalt.err (!%p872_p7)
}
 0xf0d   : > { %659 = dma.vmem_to_hbm [thread:$0]  (%p1104_p5), %s1178_s6, 128, %s1176_s25, %s476_s26  }
 0xf0e PF: > { %s501_s21 = sand.u32 1, %s910_s15   ;;  %p1243_p12 = scmp.ne.s32.totalorder %s1230_s22, 0 }
 0xf0f   : > { %p1244_p2 = scmp.ge.s32.totalorder %s922_s18, 2  ;;  %s502_s23 = scalar_lea.sflag [#allocation4], %s501_s21 }
 0xf11   : > { %p676_p1 = pnand %p1244_p2, %p1243_p12 }
 0xf13   : > { %905 = dma.done.wait (!%p676_p1), %s502_s23, 128  }
 0xf14   : > { %907 = vsyncadd (!%p676_p1), %s502_s23, 4294967168  ;;  %p19_p4 = scmp.ge.s32.totalorder %s1090_s10, 4   ;;  %s1245_s15 = smov %s914_s16 }
 0xf15   : > { %s1246_s16 = smov %s918_s17  ;;  %s1247_s17 = smov %s1100_s12 }
 0xf16   : > { %s1248_s18 = smov %s1090_s10  ;;  %21 = sbr.rel (!%p19_p4) target bundleno = 7 (0x7), region = 93 }
 0xf1d   :  { %507 = vsyncpa [#allocation3], 1 }
 0xf1e   :  { %509 = vsyncpa [#allocation3 + $0x1], 1 }
 0xf1f   :  { %510 = vsyncpa [#allocation6], 1 }
 0xf20   :  { %511 = vsyncpa [#allocation9], 1 }
 0xf21   :  { %512 = vsyncpa [#allocation4], 1 }
 0xf22   :  { %514 = vsyncpa [#allocation4 + $0x1], 1 }

</bundles_post_ra>
